<compile_context>
chip_gen: v7x
topology: tpu7x:2x2x1
jax: 0.10.0
libtpu: 0.0.40
codegen_flags: <defaults>
</compile_context>

<pallas_src>
import functools

import jax
import jax.numpy as jnp
from jax import lax
from jax.experimental import pallas as pl
from jax.experimental.pallas import tpu as pltpu

LANE = 128


# ----------------------------- Pallas kernel --------------------------------
def pdown_kernel(x_ref, xh_ref, m_ref, mh_ref, lhs_ref, shift_ref,
                 out_ref, mask_out_ref, *, wd, slide_winsize, neg_slope):
    tile = x_ref.shape[1]

    # Current tile + right halo of the phase slabs (halo covers the max tap shift Wd+1).
    x = jnp.concatenate([x_ref[...], xh_ref[...]], axis=1)                 # (C4, tile+halo) f32
    m = jnp.concatenate([m_ref[...], mh_ref[...]], axis=1).astype(jnp.float32)
    xm = x * m          # PartialConv2d multiplies the input by the mask before the conv.

    # In-VMEM patch build: k=4,s=2 conv on the space-to-depth slab collapses to 4 static
    # lane shifts of the slab; stacking them gives the im2col matrix without HBM inflation.
    shifts = (0, 1, wd, wd + 1)                       # (kh//2, kw//2) = (0,0),(0,1),(1,0),(1,1)
    rhs = jnp.concatenate([xm[:, s:s + tile] for s in shifts] +
                          [m[:, s:s + tile] for s in shifts], axis=0)       # (2K, tile)

    # Single MXU matmul: rows [0, outC) of lhs hold the BN-scale-folded conv weight,
    # row outC holds the all-ones mask-update weight (block-diagonal layout, built in glue).
    res = jnp.dot(lhs_ref[...], rhs, preferred_element_type=jnp.float32)    # (lhs_rows, tile)

    out_c = out_ref.shape[0]
    raw = res[:out_c]                                                       # (outC, tile)
    msum = res[out_c:out_c + 1]                                             # (1, tile)

    update_mask = jnp.clip(msum, 0.0, 1.0)
    # Exact reciprocal: approx=True (~1e-3 rel err) is too coarse for the 1e-4 tolerance.
    ratio = slide_winsize * pl.reciprocal(msum + 1e-8, approx=False) * update_mask

    out = raw * ratio + shift_ref[...]                 # BN scale already folded into lhs
    out = jnp.where(out > 0, out, neg_slope * out)     # LeakyReLU(0.1)

    out_ref[...] = out
    mask_out_ref[...] = update_mask


# ------------------------------ JAX glue -------------------------------------
def _phase_slab(t, dtype):
    """(N, C, H, W) -> zero-pad by 1, space-to-depth by 2 -> (C*4, N*Hd*Wd).
    Rows ordered (c, ph, pw); columns ordered (n, dh, dw).  Pure permutation (~1x traffic),
    no im2col inflation."""
    N, C, H, W = t.shape
    tp = jnp.pad(t, ((0, 0), (0, 0), (1, 1), (1, 1)))
    Hd, Wd = (H + 2) // 2, (W + 2) // 2
    s = tp.reshape(N, C, Hd, 2, Wd, 2)                  # (n, c, dh, ph, dw, pw)
    s = jnp.transpose(s, (1, 3, 5, 0, 2, 4))            # (c, ph, pw, n, dh, dw)
    return s.reshape(C * 4, N * Hd * Wd).astype(dtype), Hd, Wd


def pdown_forward(x, mask, weight, bn_scale, bn_shift, *, tile_p=2048):
    """x, mask: (N, inC, H, W) f32; weight: (outC, inC, 4, 4); bn_scale/bn_shift: (outC,).
    Returns (y, update_mask) in NCHW, matching the eval-mode PyTorch module."""
    N, inC, H, W = x.shape
    outC = weight.shape[0]
    assert H % 2 == 0 and W % 2 == 0, "k=4,s=2,p=1 fused path assumes even H, W"
    # TODO(synk): odd H/W would need one extra row/col of padding in the phase slab.

    Ho, Wo = H // 2, W // 2
    slide_winsize = float(inC * 16)

    # Phase slabs (fused-im2col inputs).  Mask is exactly {0,1} -> bf16 cast is exact
    # and halves that HBM stream.
    x_slab, Hd, Wd = _phase_slab(x.astype(jnp.float32), jnp.float32)
    m_slab, _, _ = _phase_slab(mask.astype(jnp.float32), jnp.bfloat16)
    C4 = 4 * inC
    K = 4 * C4                      # = inC * 16 patch rows per stream
    Qd = N * Hd * Wd

    # Tile selection: lane-dense tiles; halo covers the largest tap shift (Wd + 1).
    halo = ((Wd + 1 + LANE - 1) // LANE) * LANE
    tile = max(halo, (int(tile_p) // halo) * halo)
    n_tiles = -(-Qd // tile)
    if n_tiles == 1 and Qd > halo:
        # Keep >= 2 grid steps so the "parallel" axis can shard across v7x's 2 TensorCores.
        tile = ((-(-Qd // 2)) + halo - 1) // halo * halo
        n_tiles = -(-Qd // tile)
    Qpad = n_tiles * tile + halo    # +halo so the last tile's halo block stays in-bounds

    x_slab = jnp.pad(x_slab, ((0, 0), (0, Qpad - Qd)))
    m_slab = jnp.pad(m_slab, ((0, 0), (0, Qpad - Qd)))

    # LHS = [ W * bn_scale | 0 ; 0 | ones ]  (block-diagonal -> one dot gives conv + mask-sum).
    # Weight reorder (o,c,kh,kw) -> (o, g, c, ph, pw) with g = (kh//2)*2 + (kw//2),
    # ph = kh%2, pw = kw%2, matching the kernel's RHS row order (shift group, slab row).
    w6 = weight.astype(jnp.float32).reshape(outC, inC, 2, 2, 2, 2)     # (o, c, a, ph, b, pw)
    w_r = jnp.transpose(w6, (0, 2, 4, 1, 3, 5)).reshape(outC, K)
    w_scaled = w_r * bn_scale.astype(jnp.float32)[:, None]             # fold BN scale in
    lhs_rows = max(8, -(-(outC + 1) // 8) * 8)                         # f32 sublane alignment
    lhs = jnp.zeros((lhs_rows, 2 * K), jnp.float32)
    lhs = lhs.at[:outC, :K].set(w_scaled)
    lhs = lhs.at[outC, K:].set(1.0)

    shift = bn_shift.astype(jnp.float32).reshape(outC, 1)

    # VMEM sizing from the actual buffers (explicit headroom for v7x's 64 MiB / TC).
    buf = (2 * (C4 * (tile + halo) * (4 + 2))       # x(f32) + m(bf16) streams, double-buffered
           + 2 * (outC + 1) * tile * 4              # outputs, double-buffered
           + lhs_rows * 2 * K * 4 + outC * 4        # resident weight / shift
           + 2 * K * tile * 4                       # in-kernel RHS temporary
           + 4 * C4 * (tile + halo) * 4)            # cat / xm temporaries
    vmem_limit = int(min(32 * 1024 * 1024, max(8 * 1024 * 1024, 4 * buf)))

    kernel = functools.partial(pdown_kernel, wd=Wd,
                               slide_winsize=slide_winsize, neg_slope=0.1)
    tile_over_halo = tile // halo

    out_flat, mask_row = pl.pallas_call(
        kernel,
        out_shape=(jax.ShapeDtypeStruct((outC, n_tiles * tile), jnp.float32),
                   jax.ShapeDtypeStruct((1, n_tiles * tile), jnp.float32)),
        grid_spec=pltpu.PrefetchScalarGridSpec(
            num_scalar_prefetch=0,
            grid=(n_tiles,),
            in_specs=[
                pl.BlockSpec((C4, tile), lambda i: (0, i)),                         # x slab tile
                pl.BlockSpec((C4, halo), lambda i: (0, (i + 1) * tile_over_halo)),  # x right halo
                pl.BlockSpec((C4, tile), lambda i: (0, i)),                         # mask slab tile
                pl.BlockSpec((C4, halo), lambda i: (0, (i + 1) * tile_over_halo)),  # mask halo
                pl.BlockSpec((lhs_rows, 2 * K), lambda i: (0, 0)),                  # fused weight
                pl.BlockSpec((outC, 1), lambda i: (0, 0)),                          # BN shift
            ],
            out_specs=[
                pl.BlockSpec((outC, tile), lambda i: (0, i)),    # y: lane-dense stores
                pl.BlockSpec((1, tile), lambda i: (0, i)),       # update_mask row
            ],
        ),
        compiler_params=pltpu.CompilerParams(
            dimension_semantics=("parallel",),
            vmem_limit_bytes=vmem_limit,
        ),
    )(x_slab, x_slab, m_slab, m_slab, lhs, shift)

    # Valid output columns are the (dh < Ho, dw < Wo) sub-grid of the phase grid.
    o = out_flat[:, :Qd].reshape(outC, N, Hd, Wd)[:, :, :Ho, :Wo]
    # TODO(synk): consumers that accept channel-major (outC, N, Ho, Wo) could skip this transpose.
    y = jnp.transpose(o, (1, 0, 2, 3))
    um1 = mask_row[0, :Qd].reshape(N, Hd, Wd)[:, :Ho, :Wo].reshape(N, 1, Ho, Wo)
    # TODO(synk): consumers could keep the (N,1,Ho,Wo) row and broadcast lazily.
    um = jnp.broadcast_to(um1, (N, outC, Ho, Wo))
    return y, um


# --------------------------- pure-JAX reference ------------------------------
def pdown_reference(x, mask, weight, bn_scale, bn_shift):
    outC, inC = weight.shape[0], weight.shape[1]
    dn = ("NCHW", "OIHW", "NCHW")
    conv = lambda a, w: lax.conv_general_dilated(
        a, w, window_strides=(2, 2), padding=((1, 1), (1, 1)), dimension_numbers=dn)
    slide = float(inC * 16)
    um = conv(mask, jnp.ones((outC, inC, 4, 4), jnp.float32))
    ratio = slide / (um + 1e-8)
    umc = jnp.clip(um, 0.0, 1.0)
    ratio = ratio * umc
    raw = conv(x * mask, weight)
    out = raw * ratio
    out = out * bn_scale[None, :, None, None] + bn_shift[None, :, None, None]
    out = jnp.where(out > 0, out, 0.1 * out)
    return out, umc


# --------------------------------- main --------------------------------------
if __name__ == "__main__":
    key = jax.random.PRNGKey(0)
    k_x, k_m, k_w, k_g, k_b, k_rm, k_rv = jax.random.split(key, 7)

    N, inC, H, W = 2, 4, 16, 16
    outC = 8

    x = jax.random.normal(k_x, (N, inC, H, W), jnp.float32)
    mask = (jax.random.uniform(k_m, (N, inC, H, W)) > 0.3).astype(jnp.float32)

    # Conv weight (bias=False since norm='BN'); kaiming-like deterministic init.
    fan_in = inC * 4 * 4
    weight = jax.random.normal(k_w, (outC, inC, 4, 4), jnp.float32) * (2.0 / fan_in) ** 0.5

    # BatchNorm2d (eval mode) parameters / running stats, folded to scale & shift.
    # TODO(synk): training-mode BN (batch statistics) would need a cross-tile reduction.
    gamma = 1.0 + 0.1 * jax.random.normal(k_g, (outC,), jnp.float32)
    beta = 0.1 * jax.random.normal(k_b, (outC,), jnp.float32)
    running_mean = 0.1 * jax.random.normal(k_rm, (outC,), jnp.float32)
    running_var = 1.0 + 0.1 * jax.random.uniform(k_rv, (outC,), jnp.float32)
    eps = 1e-5
    bn_scale = gamma / jnp.sqrt(running_var + eps)
    bn_shift = beta - running_mean * bn_scale

    y, um = pdown_forward(x, mask, weight, bn_scale, bn_shift)
    jax.block_until_ready((y, um))

    y_ref, um_ref = pdown_reference(x, mask, weight, bn_scale, bn_shift)
    assert y.shape == (N, outC, H // 2, W // 2)
    assert um.shape == (N, outC, H // 2, W // 2)
    assert jnp.allclose(y, y_ref, atol=1e-4, rtol=1e-4), "output mismatch vs reference"
    assert jnp.allclose(um, um_ref, atol=1e-5, rtol=1e-5), "mask mismatch vs reference"

    print("KERNEL_OK")
</pallas_src>

<mosaic_0001>
module attributes {stable_mosaic.version = 11 : i64} {
  func.func @pdown_kernel(%arg0: i32, %arg1: memref<16x128xf32, #tpu.memory_space<vmem>>, %arg2: memref<16x128xf32, #tpu.memory_space<vmem>>, %arg3: memref<16x128xbf16, #tpu.memory_space<vmem>>, %arg4: memref<16x128xbf16, #tpu.memory_space<vmem>>, %arg5: memref<16x128xf32, #tpu.memory_space<vmem>>, %arg6: memref<8x1xf32, #tpu.memory_space<vmem>>, %arg7: memref<8x128xf32, #tpu.memory_space<vmem>>, %arg8: memref<1x128xf32, #tpu.memory_space<vmem>>) attributes {dimension_semantics = [#tpu.dimension_semantics<parallel>], iteration_bounds = array<i64: 2>, scalar_prefetch = 0 : i64, scratch_operands = 0 : i64, tpu.core_type = #tpu.core_type<tc>, window_params = [{transform_indices = @transform_0, window_bounds = array<i64: 16, 128>}, {transform_indices = @transform_1, window_bounds = array<i64: 16, 128>}, {transform_indices = @transform_2, window_bounds = array<i64: 16, 128>}, {transform_indices = @transform_3, window_bounds = array<i64: 16, 128>}, {pipeline_mode = #tpu.pipeline_mode<synchronous>, transform_indices = @transform_4, window_bounds = array<i64: 16, 128>}, {pipeline_mode = #tpu.pipeline_mode<synchronous>, transform_indices = @transform_5, window_bounds = array<i64: 8, 1>}, {transform_indices = @transform_6, window_bounds = array<i64: 8, 128>}, {transform_indices = @transform_7, window_bounds = array<i64: 1, 128>}]} {
    %c0 = arith.constant 0 : index
    %c0_0 = arith.constant 0 : index
    %0 = vector.load %arg1[%c0, %c0_0] : memref<16x128xf32, #tpu.memory_space<vmem>>, vector<16x128xf32>
    %c0_1 = arith.constant 0 : index
    %c0_2 = arith.constant 0 : index
    %1 = vector.load %arg2[%c0_1, %c0_2] : memref<16x128xf32, #tpu.memory_space<vmem>>, vector<16x128xf32>
    %2 = tpu.concatenate %0, %1 in 1 : vector<16x128xf32>, vector<16x128xf32> -> vector<16x256xf32>
    %c0_3 = arith.constant 0 : index
    %c0_4 = arith.constant 0 : index
    %3 = vector.load %arg3[%c0_3, %c0_4] : memref<16x128xbf16, #tpu.memory_space<vmem>>, vector<16x128xbf16>
    %c0_5 = arith.constant 0 : index
    %c0_6 = arith.constant 0 : index
    %4 = vector.load %arg4[%c0_5, %c0_6] : memref<16x128xbf16, #tpu.memory_space<vmem>>, vector<16x128xbf16>
    %5 = tpu.concatenate %3, %4 in 1 : vector<16x128xbf16>, vector<16x128xbf16> -> vector<16x256xbf16>
    %6 = arith.extf %5 : vector<16x256xbf16> to vector<16x256xf32>
    %7 = arith.mulf %2, %6 : vector<16x256xf32>
    %8 = vector.extract_strided_slice %7 {offsets = [0, 0], sizes = [16, 128], strides = [1, 1]} : vector<16x256xf32> to vector<16x128xf32>
    %9 = vector.extract_strided_slice %7 {offsets = [0, 1], sizes = [16, 128], strides = [1, 1]} : vector<16x256xf32> to vector<16x128xf32>
    %10 = vector.extract_strided_slice %7 {offsets = [0, 9], sizes = [16, 128], strides = [1, 1]} : vector<16x256xf32> to vector<16x128xf32>
    %11 = vector.extract_strided_slice %7 {offsets = [0, 10], sizes = [16, 128], strides = [1, 1]} : vector<16x256xf32> to vector<16x128xf32>
    %12 = vector.extract_strided_slice %6 {offsets = [0, 0], sizes = [16, 128], strides = [1, 1]} : vector<16x256xf32> to vector<16x128xf32>
    %13 = vector.extract_strided_slice %6 {offsets = [0, 1], sizes = [16, 128], strides = [1, 1]} : vector<16x256xf32> to vector<16x128xf32>
    %14 = vector.extract_strided_slice %6 {offsets = [0, 9], sizes = [16, 128], strides = [1, 1]} : vector<16x256xf32> to vector<16x128xf32>
    %15 = vector.extract_strided_slice %6 {offsets = [0, 10], sizes = [16, 128], strides = [1, 1]} : vector<16x256xf32> to vector<16x128xf32>
    %16 = tpu.concatenate %8, %9, %10, %11, %12, %13, %14, %15 in 0 : vector<16x128xf32>, vector<16x128xf32>, vector<16x128xf32>, vector<16x128xf32>, vector<16x128xf32>, vector<16x128xf32>, vector<16x128xf32>, vector<16x128xf32> -> vector<128x128xf32>
    %c0_7 = arith.constant 0 : index
    %c0_8 = arith.constant 0 : index
    %17 = vector.load %arg5[%c0_7, %c0_8] : memref<16x128xf32, #tpu.memory_space<vmem>>, vector<16x128xf32>
    %cst = arith.constant dense<0.000000e+00> : vector<16x128xf32>
    %18 = tpu.matmul %17, %16, %cst {dimension_numbers = #tpu.dot_dimension_numbers<[1], [0], [0], [1], [0, 0, 1, 1], [], []>} : vector<16x128xf32>, vector<128x128xf32>, vector<16x128xf32> -> vector<16x128xf32>
    %19 = vector.extract_strided_slice %18 {offsets = [0, 0], sizes = [8, 128], strides = [1, 1]} : vector<16x128xf32> to vector<8x128xf32>
    %20 = vector.extract_strided_slice %18 {offsets = [8, 0], sizes = [1, 128], strides = [1, 1]} : vector<16x128xf32> to vector<1x128xf32>
    %cst_9 = arith.constant 0.000000e+00 : f32
    %cst_10 = arith.constant 1.000000e+00 : f32
    %21 = vector.broadcast %cst_9 : f32 to vector<1x128xf32>
    %22 = arith.maximumf %21, %20 : vector<1x128xf32>
    %23 = vector.broadcast %cst_10 : f32 to vector<1x128xf32>
    %24 = arith.minimumf %23, %22 : vector<1x128xf32>
    %cst_11 = arith.constant 9.99999993E-9 : f32
    %25 = vector.broadcast %cst_11 : f32 to vector<1x128xf32>
    %26 = arith.addf %20, %25 : vector<1x128xf32>
    %27 = tpu.reciprocal %26 : vector<1x128xf32> -> vector<1x128xf32>
    %cst_12 = arith.constant 6.400000e+01 : f32
    %28 = vector.broadcast %cst_12 : f32 to vector<1x128xf32>
    %29 = arith.mulf %28, %27 : vector<1x128xf32>
    %30 = arith.mulf %29, %24 : vector<1x128xf32>
    %31 = vector.broadcast %30 : vector<1x128xf32> to vector<8x128xf32>
    %32 = arith.mulf %19, %31 : vector<8x128xf32>
    %c0_13 = arith.constant 0 : index
    %c0_14 = arith.constant 0 : index
    %33 = vector.load %arg6[%c0_13, %c0_14] : memref<8x1xf32, #tpu.memory_space<vmem>>, vector<8x1xf32>
    %34 = vector.broadcast %33 : vector<8x1xf32> to vector<8x128xf32>
    %35 = arith.addf %32, %34 : vector<8x128xf32>
    %cst_15 = arith.constant 0.000000e+00 : f32
    %36 = vector.broadcast %cst_15 : f32 to vector<8x128xf32>
    %37 = arith.cmpf ogt, %35, %36 : vector<8x128xf32>
    %cst_16 = arith.constant 1.000000e-01 : f32
    %38 = vector.broadcast %cst_16 : f32 to vector<8x128xf32>
    %39 = arith.mulf %38, %35 : vector<8x128xf32>
    %40 = arith.select %37, %35, %39 : vector<8x128xi1>, vector<8x128xf32>
    %c0_17 = arith.constant 0 : index
    %c0_18 = arith.constant 0 : index
    %41 = vector.load %arg7[%c0_17, %c0_18] : memref<8x128xf32, #tpu.memory_space<vmem>>, vector<8x128xf32>
    tpu.vector_store %arg7[%c0_17, %c0_18], %40 {strides = array<i32>} : memref<8x128xf32, #tpu.memory_space<vmem>>, vector<8x128xf32>,
    %c0_19 = arith.constant 0 : index
    %c0_20 = arith.constant 0 : index
    %42 = vector.load %arg8[%c0_19, %c0_20] : memref<1x128xf32, #tpu.memory_space<vmem>>, vector<1x128xf32>
    tpu.vector_store %arg8[%c0_19, %c0_20], %24 {strides = array<i32>} : memref<1x128xf32, #tpu.memory_space<vmem>>, vector<1x128xf32>,
    return
  }
  func.func @transform_0(%arg0: i32) -> (i32, i32) {
    %c0_i32 = arith.constant 0 : i32
    %c0_i32_0 = arith.constant 0 : i32
    return %c0_i32, %arg0 : i32, i32
  }
  func.func @transform_1(%arg0: i32) -> (i32, i32) {
    %c1_i32 = arith.constant 1 : i32
    %0 = arith.addi %arg0, %c1_i32 : i32
    %c1_i32_0 = arith.constant 1 : i32
    %1 = arith.muli %0, %c1_i32_0 : i32
    %c0_i32 = arith.constant 0 : i32
    %c0_i32_1 = arith.constant 0 : i32
    return %c0_i32, %1 : i32, i32
  }
  func.func @transform_2(%arg0: i32) -> (i32, i32) {
    %c0_i32 = arith.constant 0 : i32
    %c0_i32_0 = arith.constant 0 : i32
    return %c0_i32, %arg0 : i32, i32
  }
  func.func @transform_3(%arg0: i32) -> (i32, i32) {
    %c1_i32 = arith.constant 1 : i32
    %0 = arith.addi %arg0, %c1_i32 : i32
    %c1_i32_0 = arith.constant 1 : i32
    %1 = arith.muli %0, %c1_i32_0 : i32
    %c0_i32 = arith.constant 0 : i32
    %c0_i32_1 = arith.constant 0 : i32
    return %c0_i32, %1 : i32, i32
  }
  func.func @transform_4(%arg0: i32) -> (i32, i32) {
    %c0_i32 = arith.constant 0 : i32
    %c0_i32_0 = arith.constant 0 : i32
    %c0_i32_1 = arith.constant 0 : i32
    return %c0_i32, %c0_i32_0 : i32, i32
  }
  func.func @transform_5(%arg0: i32) -> (i32, i32) {
    %c0_i32 = arith.constant 0 : i32
    %c0_i32_0 = arith.constant 0 : i32
    %c0_i32_1 = arith.constant 0 : i32
    return %c0_i32, %c0_i32_0 : i32, i32
  }
  func.func @transform_6(%arg0: i32) -> (i32, i32) {
    %c0_i32 = arith.constant 0 : i32
    %c0_i32_0 = arith.constant 0 : i32
    return %c0_i32, %arg0 : i32, i32
  }
  func.func @transform_7(%arg0: i32) -> (i32, i32) {
    %c0_i32 = arith.constant 0 : i32
    %c0_i32_0 = arith.constant 0 : i32
    return %c0_i32, %arg0 : i32, i32
  }
}

</mosaic_0001>

<bundles_post_ra>
// kernel: tpu_custom_call.1
= control target key start
LH: loop header
LB: loop body
LE: loop exit
PB: predicated region body
PF: predicated region fallthrough
CT: control target
= control target key end

     0   :  { %s1852_s0 = inlined_call_operand.hbm [shape: f32[16,384], index: 0, kind: input, shape index: {}]   ;;  %s1853_s1 = inlined_call_operand.hbm [shape: f32[16,384], index: 1, kind: input, shape index: {}]   ;;  %s1854_s2 = inlined_call_operand.hbm [shape: bf16[16,384], index: 2, kind: input, shape index: {}]   ;;  %s1855_s3 = inlined_call_operand.hbm [shape: bf16[16,384], index: 3, kind: input, shape index: {}]   ;;  %s1856_s4 = inlined_call_operand.vmem [shape: f32[16,128], index: 4, kind: input, shape index: {}]   ;;  %s1857_s5 = inlined_call_operand.vmem [shape: f32[8,1], index: 5, kind: input, shape index: {}]   ;;  %s1858_s6 = inlined_call_operand.hbm [shape: f32[8,256], index: 6, kind: output, shape index: {0}]   ;;  %s1859_s7 = inlined_call_operand.hbm [shape: f32[1,256], index: 7, kind: output, shape index: {1}]  }
   0x1   :  { %1879 = sst [smem:[#allocation26_spill]] %s1852_s0 }
   0x2   :  { %1880 = sst [smem:[#allocation27_spill]] %s1853_s1 }
   0x3   :  { %1881 = sst [smem:[#allocation28_spill]] %s1858_s6 }
   0x4   :  { %1882 = sst [smem:[#allocation29_spill]] %s1859_s7 }
   0x5   :  { %13 = vsyncpa [#allocation3], 0 }
   0x6   :  { %15 = vsyncpa [#allocation3 + $0x1], 0 }
   0x7   :  { %16 = vsyncpa [#allocation6], 0 }
   0x8   :  { %18 = vsyncpa [#allocation6 + $0x1], 0 }
   0x9   :  { %19 = vsyncpa [#allocation9], 0 }
   0xa   :  { %21 = vsyncpa [#allocation9 + $0x1], 0 }
   0xb   :  { %22 = vsyncpa [#allocation4], 0 }
   0xc   :  { %24 = vsyncpa [#allocation4 + $0x1], 0 }
   0xd   :  { %25 = vsyncpa [#allocation12], 0 }
   0xe   :  { %27 = vsyncpa [#allocation12 + $0x1], 0  ;;  %s1424_s24 = smov 0   ;;  %s1426_s25 = smov 0  }
   0xf   :  { %s1428_s26 = smov 0   ;;  %s1430_s27 = smov 0  }
  0x10   :  { %s1432_s28 = smov 0   ;;  %s1434_s29 = smov 0  }
  0x11   :  { %s1436_s30 = smov 0  }
  0x12 LB: > { %1883 = sst [smem:[#allocation19_spill]] %s1350_s26  ;;  %s1458_s8 = sadd.s32 4294967295, %s1366_s30   ;;  %s1366_s30 = sphi %s1436_s30, %s1922_s30   ;;  %s1362_s29 = sphi %s1434_s29, %s1926_s29   ;;  %s1358_s28 = sphi %s1432_s28, %s1930_s28   ;;  %s1354_s27 = sphi %s1430_s27, %s1929_s27   ;;  %s1350_s26 = sphi %s1428_s26, %s1924_s26   ;;  %s1346_s25 = sphi %s1426_s25, %s1928_s25   ;;  %s1342_s24 = sphi %s1424_s24, %s1927_s24  }
  0x13   : > { %1884 = sst [smem:[#allocation20_spill]] %s1354_s27  ;;  %s1461_s9 = sadd.s32 1, %s1366_s30  }
  0x14   : > { %1885 = sst [smem:[#allocation21_spill]] %s1362_s29  ;;  %p1863_p0 = scmp.eq.s32.totalorder %s1366_s30, 0 }
  0x15   : > { %1886 = sst [smem:[#allocation22_spill]] %s1461_s9  ;;  %p1862_p1 = scmp.eq.s32.totalorder %s1458_s8, 0 }
  0x16   : > { %s64_s10 = sadd.s32 1, %s1461_s9  ;;  %s68_s11 = sadd.s32 1, %s1350_s26 }
  0x17   : > { %s65_s12 = ssub.s32 %s1461_s9, %s64_s10  ;;  %p75_p2 = scmp.ne.s32.totalorder %s1350_s26, %s1346_s25 }
  0x18   : > { %p66_p3 = scmp.eq.s32.totalorder %s65_s12, 0  ;;  %p81_p4 = scmp.ne.s32.totalorder %s1346_s25, %s1342_s24 }
  0x19   : > { %p1473_p5 = por %p75_p2, %p1863_p0  ;;  %p1861_p8 = scmp.lt.s32.totalorder %s1366_s30, 2 }
  0x1a   : > { %s1479_s14 = scalar_select %p66_p3, %s1350_s26, %s68_s11  }
  0x1b   : > { %p1483_p7 = por %p81_p4, %p1862_p1  ;;  %s1860_s16 = sshll.u32 %s1366_s30, 7 }
  0x1c   : > { %1888 = sst [smem:[#allocation23_spill]] %s1479_s14  ;;  %s279_s17 = sand.u32 1, %s1366_s30  }
  0x1d   : > { %s1889_s15 = scalar_select %p1483_p7, 1, 0 }
  0x1e   : > { %s1491_s18 = sand.u32 1, %s1350_s26   ;;  %s1890_s1 = sld [smem:[#allocation27_spill]] }
  0x1f   : > { %s841_s19 = sshll.u32 %s1491_s18, 4  ;;  %p1507_p9 = pnand %p1861_p8, %p1473_p5 }
  0x20   : > { %s283_s24 = scalar_lea.vmem [#allocation5], %s841_s19  ;;  %s1513_s12 = scalar_lea.sflag [#allocation6], %s279_s17 }
  0x21   : > { %s290_s10 = sshll.u32 %s283_s24, 4  ;;  %p1874_p13 = pneg %p1507_p9  ;;  %s1501_s10 = int_to_ptr.vmem [resolvable:$true] %s290_s10 }
  0x24   : > { %s720_s22 = scalar_lea.hbm %s1890_s1, %s1860_s16  ;;  %s1115_s21 = scalar_lea.hbm %s1890_s1, 768 }
  0x25   : > { %s1499_s23 = scalar_lea.hbm %s720_s22, 128  ;;  %s1140_s20 = scalar_lea.hbm %s720_s22, 384 }
  0x26   : > { %p1111_p12 = scmp.ne.s32.totalorder %s1499_s23, %s1140_s20  ;;  %p1116_p4 = scmp.lt.u32.totalorder %s1499_s23, %s1890_s1 }
  0x27   : > { %p1117_p5 = scmp.lt.u32.totalorder %s1115_s21, %s1140_s20  ;;  %p1119_p8 = scmp.lt.u32.totalorder %s1140_s20, %s1499_s23 }
  0x28   : > { %p1113_p2 = pnand %p1874_p13, %p1111_p12 }
  0x29   : > { %p1118_p6 = por %p1117_p5, %p1116_p4 }
  0x2a   : > { %p1114_p3 = pneg %p1113_p2 }
  0x2b   : > { %p1120_p1 = por %p1119_p8, %p1118_p6 }
  0x2d   : > { %p1121_p0 = pnand %p1120_p1, %p1114_p3 }
  0x2f   : > { %1124 = shalt.err (!%p1121_p0)
}
  0x30   : > { %s1125_s17 = scalar_lea.vmem %s1501_s10, 256  ;;  %s1368_s22 = smov [#allocation5]  }
  0x31   : > { %p1126_p12 = scmp.ne.s32.totalorder %s1501_s10, %s1125_s17  ;;  %s1130_s13 = sshll.u32 %s1368_s22, 4  ;;  %s1131_s13 = int_to_ptr.vmem [resolvable:$false] %s1130_s13 }
  0x32   : > { %s1132_s16 = scalar_lea.vmem %s1131_s13, 512  ;;  %p1133_p11 = scmp.lt.s32.totalorder %s1501_s10, %s1131_s13 }
  0x33   : > { %p1128_p2 = pnand %p1126_p12, %p1874_p13  ;;  %p1134_p4 = scmp.lt.s32.totalorder %s1132_s16, %s1125_s17 }
  0x35   : > { %p1129_p10 = pneg %p1128_p2  ;;  %p1135_p5 = por %p1134_p4, %p1133_p11 }
  0x37   : > { %p1136_p6 = pnand %p1135_p5, %p1129_p10 }
  0x39   : > { %1139 = shalt.err (!%p1136_p6)
}
  0x3a   : > { %s1864_s20 = smov 384   ;;  %s1865_s19 = smov 128  }
  0x3b   : > { %s1866_s21 = smov 8   ;;  %p1892_p0 = scmp.lt.s32.totalorder %s1366_s30, 3 }
  0x3c   : > { %963 = dma.hbm_to_vmem [thread:$0]  (!%p1507_p9), %s1499_s23, 256, %s1501_s10, %s1513_s12, %s1864_s20, %s1865_s19, %s1866_s21  }
  0x3d   : > { %p1893_p1 = scmp.ge.s32.totalorder %s1366_s30, 1  ;;  %s836_s17 = sadd.s32 4294967294, %s1366_s30  }
  0x3e   : > { %s37_s22 = ssub.s32 %s1366_s30, %s1461_s9  ;;  %s40_s13 = sadd.s32 1, %s1362_s29 }
  0x3f   : > { %p1547_p8 = pnand %p1893_p1, %p1892_p0  ;;  %p38_p10 = scmp.eq.s32.totalorder %s37_s22, 0 }
  0x40   : > { %p47_p11 = scmp.ne.s32.totalorder %s1362_s29, %s1358_s28  ;;  %p53_p3 = scmp.ne.s32.totalorder %s1358_s28, %s1354_s27 }
  0x41   : > { %s1894_s24 = scalar_select %p1547_p8, 1, 0 }
  0x42   : > { %s1560_s16 = scalar_select %p38_p10, %s1362_s29, %s40_s13  }
  0x43   : > { %p1896_p12 = scmp.eq.s32.totalorder %s1366_s30, 0  ;;  %p1897_p4 = scmp.eq.s32.totalorder %s1458_s8, 0 }
  0x44   : > { %1895 = sst [smem:[#allocation24_spill]] %s1560_s16  ;;  %p201_p6 = scmp.eq.s32.totalorder %s1458_s8, 1 }
  0x45   : > { %p49_p2 = por %p1896_p12, %p47_p11  ;;  %p1566_p5 = por %p1897_p4, %p53_p3 }
  0x46   : > { %p207_p0 = scmp.eq.s32.totalorder %s836_s17, 1  ;;  %s1572_s10 = sand.u32 1, %s1362_s29  }
  0x47   : > { %s1898_s23 = scalar_select %p1566_p5, 1, 0 }
  0x48   : > { %s1899_s20 = sshll.u32 %s1366_s30, 7  ;;  %s1900_s0 = sld [smem:[#allocation26_spill]] }
  0x49   : > { %p1581_p1 = por %p201_p6, %p47_p11  ;;  %p1585_p10 = por %p207_p0, %p53_p3 }
  0x4a   : > { %s839_s1 = sshll.u32 %s1572_s10, 4  ;;  %p1904_p12 = scmp.lt.s32.totalorder %s1366_s30, 2 }
  0x4b   : > { %s1901_s13 = scalar_select %p1581_p1, 1, 0 }
  0x4c   : > { %s1902_s17 = scalar_select %p1585_p10, 1, 0 }
  0x4d   : > { %p1592_p4 = pnand %p1904_p12, %p49_p2  ;;  %s843_s16 = sshll.u32 %s1572_s10, 3 }
  0x4e   : > { %s1579_s22 = scalar_lea.hbm %s1900_s0, %s1899_s20  ;;  %1903 = sst [smem:[#allocation25_spill]] %s1902_s17 }
  0x4f   : > { %s263_s20 = scalar_lea.vmem [#allocation2], %s839_s1  ;;  %s260_s29 = scalar_lea.sflag [#allocation3], %s1572_s10 }
  0x50   : > { %s269_s21 = sshll.u32 %s263_s20, 4  ;;  %s1141_s14 = scalar_lea.hbm %s1579_s22, 256  ;;  %s1597_s21 = int_to_ptr.vmem [resolvable:$true] %s269_s21 }
  0x51   : > { %p1142_p11 = scmp.ne.s32.totalorder %s1579_s22, %s1141_s14  ;;  %p1143_p3 = pneg %p1592_p4 }
  0x52   : > { %s1146_s17 = scalar_lea.hbm %s1900_s0, 768  ;;  %p1147_p2 = scmp.lt.u32.totalorder %s1579_s22, %s1900_s0 }
  0x53   : > { %p1144_p6 = pnand %p1143_p3, %p1142_p11  ;;  %p1148_p12 = scmp.lt.u32.totalorder %s1146_s17, %s1141_s14 }
  0x54   : > { %p1150_p10 = scmp.lt.u32.totalorder %s1141_s14, %s1579_s22 }
  0x55   : > { %p1145_p0 = pneg %p1144_p6  ;;  %p1149_p13 = por %p1148_p12, %p1147_p2 }
  0x57   : > { %p1151_p1 = por %p1150_p10, %p1149_p13 }
  0x59   : > { %p1152_p7 = pnand %p1151_p1, %p1145_p0 }
  0x5b   : > { %1155 = shalt.err (!%p1152_p7)
}
  0x5c   : > { %s1156_s1 = scalar_lea.vmem %s1597_s21, 256  ;;  %s1372_s26 = smov [#allocation2]  }
  0x5d   : > { %p1157_p11 = scmp.ne.s32.totalorder %s1597_s21, %s1156_s1  ;;  %s1161_s9 = sshll.u32 %s1372_s26, 4  ;;  %s1162_s9 = int_to_ptr.vmem [resolvable:$false] %s1161_s9 }
  0x5e   : > { %s1163_s6 = scalar_lea.vmem %s1162_s9, 512  ;;  %p1164_p8 = scmp.lt.s32.totalorder %s1597_s21, %s1162_s9 }
  0x5f   : > { %p1159_p6 = pnand %p1157_p11, %p1143_p3  ;;  %p1165_p2 = scmp.lt.s32.totalorder %s1163_s6, %s1156_s1 }
  0x61   : > { %p1160_p5 = pneg %p1159_p6  ;;  %p1166_p12 = por %p1165_p2, %p1164_p8 }
  0x63   : > { %p1167_p13 = pnand %p1166_p12, %p1160_p5 }
  0x65   : > { %1170 = shalt.err (!%p1167_p13)
}
  0x66   : > { %s1906_s27 = smov 8   ;;  %s1907_s14 = smov 128  }
  0x67   : > { %s1908_s17 = smov 384   ;;  %s844_s20 = sshll.u32 %s1366_s30, 6 }
  0x68   : > { %960 = dma.hbm_to_vmem [thread:$0]  (!%p1592_p4), %s1579_s22, 256, %s1597_s21, %s260_s29, %s1908_s17, %s1907_s14, %s1906_s27  }
  0x69   : > { %s1636_s9 = scalar_lea.hbm %s1854_s2, %s844_s20  ;;  %s304_s6 = scalar_lea.vmem [#allocation7], %s843_s16 }
  0x6a   : > { %s310_s0 = sshll.u32 %s304_s6, 4  ;;  %s1171_s7 = scalar_lea.hbm %s1636_s9, 128  ;;  %s1640_s0 = int_to_ptr.vmem [resolvable:$true] %s310_s0 }
  0x6b   : > { %p1172_p7 = scmp.ne.s32.totalorder %s1636_s9, %s1171_s7  ;;  %s1176_s21 = scalar_lea.hbm %s1854_s2, 384 }
  0x6c   : > { %p1177_p1 = scmp.lt.u32.totalorder %s1636_s9, %s1854_s2  ;;  %p1178_p10 = scmp.lt.u32.totalorder %s1176_s21, %s1171_s7 }
  0x6d   : > { %p1174_p8 = pnand %p1172_p7, %p1143_p3  ;;  %p1180_p11 = scmp.lt.u32.totalorder %s1171_s7, %s1636_s9 }
  0x6e   : > { %p1179_p0 = por %p1178_p10, %p1177_p1 }
  0x6f   : > { %p1175_p5 = pneg %p1174_p8 }
  0x70   : > { %p1181_p6 = por %p1180_p11, %p1179_p0 }
  0x72   : > { %p1182_p2 = pnand %p1181_p6, %p1175_p5 }
  0x74   : > { %1185 = shalt.err (!%p1182_p2)
}
  0x75   : > { %s1186_s16 = scalar_lea.vmem %s1640_s0, 128  ;;  %s1373_s14 = smov [#allocation7]  }
  0x76   : > { %p1187_p12 = scmp.ne.s32.totalorder %s1640_s0, %s1186_s16  ;;  %s1191_s17 = sshll.u32 %s1373_s14, 4  ;;  %s1192_s17 = int_to_ptr.vmem [resolvable:$false] %s1191_s17 }
  0x77   : > { %s1193_s1 = scalar_lea.vmem %s1192_s17, 256  ;;  %p1194_p8 = scmp.lt.s32.totalorder %s1640_s0, %s1192_s17 }
  0x78   : > { %p1189_p13 = pnand %p1187_p12, %p1143_p3  ;;  %p1195_p1 = scmp.lt.s32.totalorder %s1193_s1, %s1186_s16 }
  0x7a   : > { %p1190_p7 = pneg %p1189_p13  ;;  %p1196_p10 = por %p1195_p1, %p1194_p8 }
  0x7c   : > { %p1197_p0 = pnand %p1196_p10, %p1190_p7 }
  0x7e   : > { %1200 = shalt.err (!%p1197_p0)
}
  0x7f   : > { %s1374_s7 = smov 192   ;;  %s1375_s26 = smov 64  }
  0x80   : > { %s1376_s6 = smov 4   ;;  %s845_s29 = sshll.u32 %s1491_s18, 3 }
  0x81   : > { %966 = dma.hbm_to_vmem [thread:$0]  (!%p1592_p4), %s1636_s9, 128, %s1640_s0, %s1513_s12, %s1374_s7, %s1375_s26, %s1376_s6  }
  0x82   : > { %s731_s27 = scalar_lea.hbm %s1855_s3, %s844_s20  ;;  %s324_s16 = scalar_lea.vmem [#allocation8], %s845_s29 }
  0x83   : > { %s1675_s10 = scalar_lea.hbm %s731_s27, 64  ;;  %s331_s14 = sshll.u32 %s324_s16, 4  ;;  %s1677_s14 = int_to_ptr.vmem [resolvable:$true] %s331_s14 }
  0x84   : > { %s321_s19 = scalar_lea.sflag [#allocation9], %s1491_s18  ;;  %s1231_s17 = scalar_lea.hbm %s731_s27, 192 }
  0x85   : > { %p1202_p3 = scmp.ne.s32.totalorder %s1675_s10, %s1231_s17  ;;  %p1909_p4 = pneg %p1507_p9 }
  0x86   : > { %s1206_s20 = scalar_lea.hbm %s1855_s3, 384  ;;  %p1207_p6 = scmp.lt.u32.totalorder %s1675_s10, %s1855_s3 }
  0x87   : > { %p1204_p5 = pnand %p1202_p3, %p1909_p4  ;;  %p1208_p2 = scmp.lt.u32.totalorder %s1206_s20, %s1231_s17 }
  0x88   : > { %p1210_p13 = scmp.lt.u32.totalorder %s1231_s17, %s1675_s10 }
  0x89   : > { %p1205_p11 = pneg %p1204_p5  ;;  %p1209_p12 = por %p1208_p2, %p1207_p6 }
  0x8b   : > { %p1211_p7 = por %p1210_p13, %p1209_p12 }
  0x8d   : > { %p1212_p8 = pnand %p1211_p7, %p1205_p11 }
  0x8f   : > { %1215 = shalt.err (!%p1212_p8)
}
  0x90   : > { %s1216_s29 = scalar_lea.vmem %s1677_s14, 128  ;;  %p1910_p10 = pmov %p1909_p4 }
  0x91   : > { %p1217_p1 = scmp.ne.s32.totalorder %s1677_s14, %s1216_s29  ;;  %s1377_s22 = smov [#allocation8]  }
  0x92   : > { %s1221_s21 = sshll.u32 %s1377_s22, 4  ;;  %s1222_s21 = int_to_ptr.vmem [resolvable:$false] %s1221_s21 }
  0x93   : > { %p1219_p0 = pnand %p1217_p1, %p1910_p10  ;;  %s1223_s27 = scalar_lea.vmem %s1222_s21, 256 }
  0x94   : > { %p1224_p4 = scmp.lt.s32.totalorder %s1677_s14, %s1222_s21  ;;  %p1225_p5 = scmp.lt.s32.totalorder %s1223_s27, %s1216_s29 }
  0x95   : > { %p1220_p3 = pneg %p1219_p0 }
  0x96   : > { %p1226_p6 = por %p1225_p5, %p1224_p4 }
  0x98   : > { %p1227_p2 = pnand %p1226_p6, %p1220_p3 }
  0x9a   : > { %1230 = shalt.err (!%p1227_p2)
}
  0x9b   : > { %969 = dma.hbm_to_vmem [thread:$0]  (!%p1507_p9), %s1675_s10, 128, %s1677_s14, %s321_s19, %s1374_s7, %s1375_s26, %s1376_s6  }
  0x9c   : > { %p1911_p11 = scmp.ne.s32.totalorder %s1894_s24, 0 }
  0x9d   : > { %s1710_s16 = sand.u32 (!%p1911_p11), 1, %s1358_s28   ;;  %p1912_p12 = scmp.ne.s32.totalorder (!%p1911_p11), %s1898_s23, 0 }
  0x9e   : > { %343 = sbr.rel (%p1911_p11) target bundleno = 594 (0x252), region = 44  ;;  %s848_s17 = sshll.u32 (!%p1911_p11), %s1710_s16, 4 }
  0x9f   : > { %s346_s0 = scalar_lea.sflag (!%p1911_p11), [#allocation3], %s1710_s16  ;;  %s349_s11 = scalar_lea.vmem (!%p1911_p11), [#allocation2], %s848_s17 }
  0xa5   : > { %1317 = dma.done.wait (%p1912_p12), %s346_s0, 256  }
  0xa6   : > { %1319 = vsyncadd (%p1912_p12), %s346_s0, 4294967040  ;;  %s354_s18 = sand.u32 1, %s1458_s8   ;;  %s356_s24 = sand.u32 1, %s1346_s25  }
  0xa7   : > { %s849_s7 = sshll.u32 %s356_s24, 4  ;;  %s355_s26 = scalar_lea.sflag [#allocation6], %s354_s18 }
  0xa8   : > { %s358_s6 = scalar_lea.vmem [#allocation5], %s849_s7  ;;  %p1913_p9 = scmp.ne.s32.totalorder %s1889_s15, 0 }
  0xaa   : > { %1321 = dma.done.wait (%p1913_p9), %s355_s26, 256  }
  0xab   : > { %1323 = vsyncadd (%p1913_p9), %s355_s26, 4294967040  ;;  %s850_s10 = sshll.u32 %s1710_s16, 3 }
  0xac   : > { %s367_s14 = scalar_lea.vmem [#allocation7], %s850_s10 }
  0xad   : > { %1325 = dma.done.wait (%p1912_p12), %s355_s26, 128  }
  0xae   : > { %1327 = vsyncadd (%p1912_p12), %s355_s26, 4294967168  ;;  %s851_s19 = sshll.u32 %s356_s24, 3  ;;  %s373_s12 = scalar_lea.sflag [#allocation9], %s356_s24 }
  0xaf   : > { %s376_s20 = scalar_lea.vmem [#allocation8], %s851_s19 }
  0xb0   : > { %1329 = dma.done.wait (%p1913_p9), %s373_s12, 128  }
  0xb1   : > { %1331 = vsyncadd (%p1913_p9), %s373_s12, 4294967168  ;;  %v428_v0 = vld [vmem:[%s349_s11] sm:$0xff]  ;;  %v1107_v2 = vld [vmem:[%s376_s20] sm:$0xff]   ;;  %s1378_s15 = smov 119   ;;  %s1379_s23 = smov 127   ;;  %v1381_v21 = vmov 0  }
  0xb2   : > { %v1735_v1 = vld [vmem:[%s367_s14] sm:$0xff]   ;;  %v429_v4 = vld [vmem:[%s349_s11 + $0x8] sm:$0xff]  ;;  %v449_v7 = vunpack.c.l.bf16 %v1107_v2  ;;  %v451_v9 = vunpack.c.h.bf16 %v1107_v2  ;;  %s1380_s9 = smov 118   ;;  %1105 = vset.pattern.permute.xlu0 %v1381_v21  ;;  %vm468_vm0 = vcmask 1039360   ;;  %vm481_vm1 = vcmask 973824   ;;  %s857_s0 = sshll.u32 %s1458_s8, 4 }
  0xb3   : > { %v430_v3 = vld [vmem:[%s358_s6] sm:$0xff]  ;;  %v431_v5 = vld [vmem:[%s358_s6 + $0x8] sm:$0xff]  ;;  %v448_v6 = vunpack.c.l.bf16 %v1735_v1  ;;  %v450_v8 = vunpack.c.h.bf16 %v1735_v1  ;;  %vm494_vm2 = vcmask 965632   ;;  %s425_s11 = scalar_lea.vmem [#allocation11], %s1710_s16  ;;  %s1914_s26 = sld [smem:[#allocation29_spill]] }
  0xb4   : > { %v453_v11 = vmul.f32 %v449_v7, %v430_v3  ;;  %v455_v13 = vmul.f32 %v451_v9, %v431_v5  ;;  %v539_v19 = vld [vmem:[%s1856_s4] sm:$0xff]  ;;  %s670_s18 = sshll.u32 %s425_s11, 4  ;;  %s645_s19 = scalar_lea.sflag [#allocation12], %s1710_s16  ;;  %s1769_s18 = int_to_ptr.vmem [resolvable:$true] %s670_s18 }
  0xb5   : > { %v452_v10 = vmul.f32 %v448_v6, %v428_v0  ;;  %v454_v12 = vmul.f32 %v450_v8, %v429_v4  ;;  %v1080_v17 = vpack.i.bf16 %v451_v9, %v450_v8  ;;  %v1075_v18 = vpack.i.bf16 %v449_v7, %v448_v6  ;;  %910 = vmatprep.mubr.f32.mxu0 %v539_v19  ;;  %v627_v20 = vld [vmem:[%s1857_s5] sm:$0xff]  ;;  %s1232_s12 = scalar_lea.vmem %s1769_s18, 16  ;;  %p1916_p7 = scmp.ne.s32.totalorder %s1901_s13, 0 }
  0xb6   : > { %p1233_p13 = scmp.ne.s32.totalorder %s1769_s18, %s1232_s12  ;;  %s1382_s20 = smov [#allocation11]  }
  0xb7   : > { %v1055_v14 = vpack.i.bf16 %v453_v11, %v452_v10  ;;  %v1060_v15 = vpack.i.bf16 %v455_v13, %v454_v12  ;;  %v913_v16 = vpack.c.bf16 %v454_v12, %v452_v10  ;;  %v540_v13 = vld [vmem:[%s1856_s4 + $0x8] sm:$0xff] }
  0xb8   : > { %p1234_p8 = pnand %p1233_p13, %p1916_p7 }
  0xb9   : > { %1056 = vrot.lane.b32.xlu1 %v1055_v14, %s1378_s15  ;;  %1046 = vrot.lane.b32.xlu0 %v1055_v14, %s1379_s23  ;;  %s1915_s6 = smov %s1914_s26  ;;  %s1767_s14 = scalar_lea.hbm %s1914_s26, %s857_s0 }
  0xba   : > { %914 = vmatprep.subr.bf16.mxu0 %v913_v16  ;;  %p1235_p1 = pneg %p1234_p8 }
  0xbb   : > { %916 = vmatpush3.bf16.msra.mxu0 %v913_v16 }
  0xbd   : > { %1061 = vrot.lane.b32.xlu1 %v1060_v15, %s1378_s15  ;;  %1051 = vrot.lane.b32.xlu0 %v1060_v15, %s1379_s23 }
  0xc1   : > { %1071 = vrot.lane.b32.xlu1 %v1060_v15, %s1380_s9  ;;  %1066 = vrot.lane.b32.xlu0 %v1055_v14, %s1380_s9 }
  0xc5   : > { %1081 = vrot.lane.b32.xlu1 %v1080_v17, %s1379_s23  ;;  %1076 = vrot.lane.b32.xlu0 %v1075_v18, %s1379_s23 }
  0xc9   : > { %1091 = vrot.lane.b32.xlu1 %v1080_v17, %s1378_s15  ;;  %1086 = vrot.lane.b32.xlu0 %v1075_v18, %s1378_s15  ;;  %s1236_s15 = sshll.u32 %s1382_s20, 4  ;;  %s1237_s15 = int_to_ptr.vmem [resolvable:$false] %s1236_s15 }
  0xca   : > { %s1238_s23 = scalar_lea.vmem %s1237_s15, 32  ;;  %p1239_p10 = scmp.lt.s32.totalorder %s1769_s18, %s1237_s15 }
  0xcb   : > { %p1240_p0 = scmp.lt.s32.totalorder %s1238_s23, %s1232_s12 }
  0xcd   : > { %1101 = vrot.lane.b32.xlu1 %v1080_v17, %s1380_s9  ;;  %1096 = vrot.lane.b32.xlu0 %v1075_v18, %s1380_s9  ;;  %v622_v18 = vlaneseq  ;;  %p1241_p3 = por %p1240_p0, %p1239_p10 }
  0xcf   : > { %p1242_p4 = pnand %p1241_p3, %p1235_p1 }
  0xd1   : > { %630 = vperm.xlu0 %1105, %v627_v20  }
 0x12b   : > { %v1057_v22 = vpop.permute.xlu1 %1056  ;;  %v1047_v23 = vpop.permute.xlu0 %1046 }
 0x12c   : > { %v1059_v24 = vunpack.i.h.bf16 %v1057_v22  ;;  %v1058_v25 = vunpack.i.l.bf16 %v1057_v22  ;;  %v1049_v26 = vunpack.i.h.bf16 %v1047_v23  ;;  %v1048_v27 = vunpack.i.l.bf16 %v1047_v23 }
 0x12e   : > { %v469_v34 = vsel %vm468_vm0, %v1048_v27, %v1049_v26  ;;  %v482_v36 = vsel %vm481_vm1, %v1058_v25, %v1059_v24 }
 0x12f   : > { %v1062_v28 = vpop.permute.xlu1 %1061  ;;  %v1052_v29 = vpop.permute.xlu0 %1051 }
 0x130   : > { %v1064_v30 = vunpack.i.h.bf16 %v1062_v28  ;;  %v1063_v31 = vunpack.i.l.bf16 %v1062_v28  ;;  %v1054_v32 = vunpack.i.h.bf16 %v1052_v29  ;;  %v1053_v33 = vunpack.i.l.bf16 %v1052_v29 }
 0x132   : > { %v470_v35 = vsel %vm468_vm0, %v1053_v33, %v1054_v32  ;;  %v483_v37 = vsel %vm481_vm1, %v1063_v31, %v1064_v30 }
 0x133   : > { %v917_v38 = vpack.c.bf16 %v470_v35, %v469_v34  ;;  %v1072_v39 = vpop.permute.xlu1 %1071  ;;  %v1067_v40 = vpop.permute.xlu0 %1066  ;;  %v921_v45 = vpack.c.bf16 %v483_v37, %v482_v36 }
 0x134   : > { %v1074_v41 = vunpack.i.h.bf16 %v1072_v39  ;;  %v1073_v42 = vunpack.i.l.bf16 %v1072_v39  ;;  %v1069_v43 = vunpack.i.h.bf16 %v1067_v40  ;;  %v1068_v44 = vunpack.i.l.bf16 %v1067_v40 }
 0x135   : > { %918 = vmatprep.subr.bf16.mxu0 %v917_v38 }
 0x136   : > { %920 = vmatpush3.bf16.msra.mxu0 %v917_v38  ;;  %v495_v46 = vsel %vm494_vm2, %v1068_v44, %v1069_v43  ;;  %v496_v47 = vsel %vm494_vm2, %v1073_v42, %v1074_v41 }
 0x137   : > { %922 = vmatprep.subr.bf16.mxu0 %v921_v45  ;;  %v925_v48 = vpack.c.bf16 %v496_v47, %v495_v46  ;;  %v1082_v49 = vpop.permute.xlu1 %1081  ;;  %v1077_v50 = vpop.permute.xlu0 %1076 }
 0x138   : > { %v1084_v51 = vunpack.i.h.bf16 %v1082_v49  ;;  %v1083_v52 = vunpack.i.l.bf16 %v1082_v49  ;;  %v1079_v53 = vunpack.i.h.bf16 %v1077_v50  ;;  %v1078_v54 = vunpack.i.l.bf16 %v1077_v50 }
 0x13a   : > { %924 = vmatpush3.bf16.msra.mxu0 %v921_v45  ;;  %v511_v57 = vsel %vm468_vm0, %v1078_v54, %v1079_v53  ;;  %v512_v58 = vsel %vm468_vm0, %v1083_v52, %v1084_v51 }
 0x13b   : > { %926 = vmatprep.subr.bf16.mxu0 %v925_v48  ;;  %v1092_v55 = vpop.permute.xlu1 %1091  ;;  %v1087_v56 = vpop.permute.xlu0 %1086  ;;  %v933_v63 = vpack.c.bf16 %v512_v58, %v511_v57 }
 0x13c   : > { %v1094_v59 = vunpack.i.h.bf16 %v1092_v55  ;;  %v1093_v60 = vunpack.i.l.bf16 %v1092_v55  ;;  %v1089_v61 = vunpack.i.h.bf16 %v1087_v56  ;;  %v1088_v62 = vunpack.i.l.bf16 %v1087_v56 }
 0x13e   : > { %928 = vmatpush3.bf16.msra.mxu0 %v925_v48  ;;  %v523_v3 = vsel %vm481_vm1, %v1088_v62, %v1089_v61  ;;  %v524_v4 = vsel %vm481_vm1, %v1093_v60, %v1094_v59 }
 0x13f   : > { %930 = vmatprep.subr.bf16.mxu0 %v1735_v1  ;;  %v1102_v0 = vpop.permute.xlu1 %1101  ;;  %v1097_v2 = vpop.permute.xlu0 %1096  ;;  %v937_v9 = vpack.c.bf16 %v524_v4, %v523_v3 }
 0x140   : > { %v1104_v5 = vunpack.i.h.bf16 %v1102_v0  ;;  %v1103_v6 = vunpack.i.l.bf16 %v1102_v0  ;;  %v1099_v7 = vunpack.i.h.bf16 %v1097_v2  ;;  %v1098_v8 = vunpack.i.l.bf16 %v1097_v2 }
 0x142   : > { %932 = vmatpush3.bf16.msra.mxu0 %v1735_v1  ;;  %v535_v10 = vsel %vm494_vm2, %v1098_v8, %v1099_v7  ;;  %v536_v11 = vsel %vm494_vm2, %v1103_v6, %v1104_v5 }
 0x143   : > { %934 = vmatprep.subr.bf16.mxu0 %v933_v63  ;;  %v941_v12 = vpack.c.bf16 %v536_v11, %v535_v10 }
 0x146   : > { %936 = vmatpush3.bf16.msra.mxu0 %v933_v63 }
 0x147   : > { %938 = vmatprep.subr.bf16.mxu0 %v937_v9 }
 0x14a   : > { %940 = vmatpush3.bf16.msra.mxu0 %v937_v9 }
 0x14b   : > { %942 = vmatprep.subr.bf16.mxu0 %v941_v12 }
 0x14e   : > { %944 = vmatpush3.bf16.msra.mxu0 %v941_v12 }
 0x151   : > { %911 = vmatmul.mubr.f32.vlgmr.msra.gmra.mrb[0].mxu0 %v540_v13 }
 0x224   : > { %v912_v14 = vpop.f32.mrb[0].mxu0 }
 0x225   : > { %v616_v1 = vmax.f32 %v912_v14, 0.0  ;;  %v618_v15 = vadd.f32 1e-08, %v912_v14  ;;  %v607_v16 = vpop.f32.mrb[1].mxu0 }
 0x227   : > { %v617_v17 = vmin.f32 %v616_v1, 1.0  ;;  %1108 = vrcp.f32 %v618_v15 }
 0x229   : > { %638 = vst [vmem:[%s425_s11] sm:$0x1] %v617_v17 }
 0x22a   : > { %1245 = shalt.err (!%p1242_p4)
}
 0x22b   : > { %s1246_s9 = scalar_lea.hbm %s1767_s14, 16  ;;  %s1250_s22 = scalar_lea.hbm %s1915_s6, 32 }
 0x22c   : > { %p1247_p5 = scmp.ne.s32.totalorder %s1767_s14, %s1246_s9  ;;  %p1251_p11 = scmp.lt.u32.totalorder %s1767_s14, %s1915_s6 }
 0x22d   : > { %p1252_p12 = scmp.lt.u32.totalorder %s1250_s22, %s1246_s9  ;;  %p1254_p13 = scmp.lt.u32.totalorder %s1246_s9, %s1767_s14 }
 0x22e   : > { %p1248_p6 = pnand %p1247_p5, %p1916_p7 }
 0x22f   : > { %p1253_p9 = por %p1252_p12, %p1251_p11 }
 0x230   : > { %p1249_p2 = pneg %p1248_p6 }
 0x231   : > { %p1255_p8 = por %p1254_p13, %p1253_p9 }
 0x233   : > { %p1256_p1 = pnand %p1255_p8, %p1249_p2 }
 0x235   : > { %1259 = shalt.err (!%p1256_p1)
}
 0x236   : > { %954 = dma.vmem_to_hbm [thread:$0]  (%p1916_p7), %s1769_s18, 16, %s1767_s14, %s645_s19   ;;  %v623_v19 = vshrl.u32 %v622_v18, 7  ;;  %v1109_v20 = vpop.eup %1108  ;;  %v631_v25 = vpop.permute.xlu0 %630 }
 0x237   : > { %v620_v21 = vmul.f32 64.0, %v1109_v20  ;;  %s856_s17 = sshll.u32 %s1458_s8, 7  ;;  %s419_s0 = scalar_lea.vmem [#allocation10], %s850_s10 }
 0x238   : > { %v624_v22 = vsub.s32 0, %v623_v19  ;;  %s657_s11 = sshll.u32 %s419_s0, 4  ;;  %s1917_s18 = sld [smem:[#allocation28_spill]]  ;;  %s1801_s11 = int_to_ptr.vmem [resolvable:$true] %s657_s11 }
 0x239   : > { %v621_v23 = vmul.f32 %v620_v21, %v617_v17  ;;  %s640_s14 = scalar_lea.sflag [#allocation4], %s1710_s16  ;;  %s1260_s19 = scalar_lea.vmem %s1801_s11, 128 }
 0x23a   : > { %p1261_p10 = scmp.ne.s32.totalorder %s1801_s11, %s1260_s19  ;;  %s1383_s8 = smov [#allocation10]  }
 0x23b   : > { %v625_v24 = vrot.slane %v621_v23, %v624_v22  ;;  %s1264_s10 = sshll.u32 %s1383_s8, 4  ;;  %s1265_s10 = int_to_ptr.vmem [resolvable:$false] %s1264_s10 }
 0x23c   : > { %p1262_p0 = pnand %p1261_p10, %p1916_p7  ;;  %s1266_s12 = scalar_lea.vmem %s1265_s10, 256 }
 0x23d   : > { %v626_v26 = vmul.f32 %v625_v24, %v607_v16  ;;  %p1267_p4 = scmp.lt.s32.totalorder %s1801_s11, %s1265_s10  ;;  %p1268_p5 = scmp.lt.s32.totalorder %s1266_s12, %s1260_s19 }
 0x23e   : > { %s1799_s26 = scalar_lea.hbm %s1917_s18, %s856_s17  ;;  %p1263_p3 = pneg %p1262_p0 }
 0x23f   : > { %v633_v27 = vadd.f32 %v631_v25, %v626_v26  ;;  %p1269_p6 = por %p1268_p5, %p1267_p4 }
 0x241   : > { %vm634_vm3 = vcmp.gt.f32.partialorder %v633_v27, 0.0  ;;  %v635_v28 = vmul.f32 0.1, %v633_v27  ;;  %p1270_p2 = pnand %p1269_p6, %p1263_p3 }
 0x243   : > { %v636_v29 = vsel %vm634_vm3, %v633_v27, %v635_v28 }
 0x244   : > { %637 = vst [vmem:[%s419_s0] sm:$0xff] %v636_v29 }
 0x245   : > { %1273 = shalt.err (!%p1270_p2)
}
 0x246   : > { %s1274_s16 = scalar_lea.hbm %s1799_s26, 128  ;;  %s1278_s23 = scalar_lea.hbm %s1917_s18, 256 }
 0x247   : > { %p1275_p11 = scmp.ne.s32.totalorder %s1799_s26, %s1274_s16  ;;  %p1279_p13 = scmp.lt.u32.totalorder %s1799_s26, %s1917_s18 }
 0x248   : > { %p1280_p8 = scmp.lt.u32.totalorder %s1278_s23, %s1274_s16  ;;  %p1282_p10 = scmp.lt.u32.totalorder %s1274_s16, %s1799_s26 }
 0x249   : > { %p1276_p12 = pnand %p1275_p11, %p1916_p7 }
 0x24a   : > { %p1281_p1 = por %p1280_p8, %p1279_p13 }
 0x24b   : > { %p1277_p9 = pneg %p1276_p12 }
 0x24c   : > { %p1283_p0 = por %p1282_p10, %p1281_p1 }
 0x24e   : > { %p1284_p3 = pnand %p1283_p0, %p1277_p9 }
 0x250   : > { %1287 = shalt.err (!%p1284_p3)
}
 0x251   : > { %953 = dma.vmem_to_hbm [thread:$0]  (%p1916_p7), %s1801_s11, 128, %s1799_s26, %s640_s14  }
 0x252 PF: > { %s1918_s29 = sld [smem:[#allocation20_spill]]  ;;  %s1919_s22 = sld [smem:[#allocation25_spill]] }
 0x253   : > { %p1921_p5 = scmp.ge.s32.totalorder %s1366_s30, 2 }
 0x258   : > { %s682_s21 = sand.u32 1, %s1918_s29   ;;  %p1920_p4 = scmp.ne.s32.totalorder %s1919_s22, 0 }
 0x259   : > { %s683_s27 = scalar_lea.sflag [#allocation4], %s682_s21 }
 0x25a   : > { %p971_p6 = pnand %p1921_p5, %p1920_p4 }
 0x25c   : > { %1333 = dma.done.wait (!%p971_p6), %s683_s27, 128  }
 0x25d   : > { %1335 = vsyncadd (!%p971_p6), %s683_s27, 4294967168  ;;  %s692_s17 = scalar_lea.sflag [#allocation12], %s682_s21 }
 0x25e   : > { %1337 = dma.done.wait (!%p971_p6), %s692_s17, 16  }
 0x25f   : > { %1339 = vsyncadd (!%p971_p6), %s692_s17, 4294967280  ;;  %s1922_s30 = sld [smem:[#allocation22_spill]]  ;;  %s1923_s13 = sld [smem:[#allocation19_spill]] }
 0x260   : > { %s1924_s26 = sld [smem:[#allocation23_spill]]  ;;  %s1925_s0 = sld [smem:[#allocation21_spill]] }
 0x261   : > { %s1926_s29 = sld [smem:[#allocation24_spill]]  ;;  %s1927_s24 = smov %s1346_s25 }
 0x262   : > { %s1929_s27 = smov %s1358_s28 }
 0x265   : > { %p30_p7 = scmp.ge.s32.totalorder %s1922_s30, 4   ;;  %s1928_s25 = smov %s1923_s13 }
 0x266   : > { %s1930_s28 = smov %s1925_s0 }
 0x267   :  { %32 = sbr.rel (!%p30_p7) target bundleno = 18 (0x12), region = 143 }
 0x26e   :  { %696 = vsyncpa [#allocation3], 1 }
 0x26f   :  { %698 = vsyncpa [#allocation3 + $0x1], 1 }
 0x270   :  { %699 = vsyncpa [#allocation6], 1 }
 0x271   :  { %701 = vsyncpa [#allocation6 + $0x1], 1 }
 0x272   :  { %702 = vsyncpa [#allocation9], 1 }
 0x273   :  { %704 = vsyncpa [#allocation9 + $0x1], 1 }
 0x274   :  { %705 = vsyncpa [#allocation4], 1 }
 0x275   :  { %707 = vsyncpa [#allocation4 + $0x1], 1 }
 0x276   :  { %708 = vsyncpa [#allocation12], 1 }
 0x277   :  { %710 = vsyncpa [#allocation12 + $0x1], 1 }

</bundles_post_ra>
